<compile_context>
chip_gen: v5e
topology: v5e:2x2
jax: 0.10.0
libtpu: 0.0.40
codegen_flags: <defaults>
</compile_context>

<pallas_src>
import jax
import jax.numpy as jnp
from jax.experimental import pallas as pl
from jax.experimental.pallas import tpu as pltpu

EMBED_SIZE = 32          # embed_size of the module (small for the demo)
FC_IN = 2048             # inception_v3 fc.in_features
DROP_P = 0.5
CONV_K = 27              # 3*3*3 im2col K
K_PAD = 32               # K padded for the MXU
COUT = 32                # Conv2d_1a_3x3 output channels
COUT_PAD = 128           # lane-dense output width
GROUPS = FC_IN // COUT   # 64 channel groups of the trunk stand-in


# ---------------------------------------------------------------------------
# Kernel A: Inception stem BasicConv2d = conv(3x3, s=2) as matmul (+BN-bias) + ReLU
# ---------------------------------------------------------------------------
def stem_conv_kernel(patch_ref, w_ref, bias_ref, o_ref):
    # patch_ref: (tm, 32) bf16   w_ref: (32, 128) bf16 (BN scale folded in)
    # bias_ref:  (1, 128) f32    o_ref: (tm, 128) bf16 (lane-dense)
    acc = jnp.dot(patch_ref[...], w_ref[...], preferred_element_type=jnp.float32)
    o_ref[...] = jnp.maximum(acc + bias_ref[...], 0.0).astype(o_ref.dtype)  # BasicConv2d ReLU


def stem_conv(patches, w, bias, *, tm=512):
    P_pad, K = patches.shape
    Cout = w.shape[1]
    return pl.pallas_call(
        stem_conv_kernel,
        out_shape=jax.ShapeDtypeStruct((P_pad, Cout), jnp.bfloat16),
        grid=(P_pad // tm,),
        in_specs=[
            pl.BlockSpec((tm, K), lambda i: (i, 0)),
            pl.BlockSpec((K, Cout), lambda i: (0, 0)),
            pl.BlockSpec((1, Cout), lambda i: (0, 0)),
        ],
        out_specs=pl.BlockSpec((tm, Cout), lambda i: (i, 0)),
        compiler_params=pltpu.CompilerParams(dimension_semantics=("parallel",)),
    )(patches, w, bias)


def _pick_row_tile(P):
    # tm=512 amortizes per-grid-step overhead (~85% of HBM roofline vs ~29% at 128);
    # shrink only so tiny demo inputs still give >=2 "parallel" grid points for v7x's 2 TCs.
    for tm in (512, 256, 128):
        if pl.cdiv(P, tm) >= 2:
            return tm
    return 128


# ---------------------------------------------------------------------------
# Kernel B: head = avgpool + inception dropout + fc + (module) ReLU + (module) dropout
# The 64x channel replication of the trunk stand-in is folded into the grouped fc weight.
# ---------------------------------------------------------------------------
def head_kernel(feat_ref, m1_ref, w_ref, b_ref, m2_ref, o_ref):
    # feat_ref: (1, S, C) bf16   m1_ref: (1, G, C) f32   w_ref: (G, E, C) f32
    # b_ref:    (1, E) f32       m2_ref: (1, 1, E) f32   o_ref: (1, 1, E) f32
    s = feat_ref.shape[1]
    # Global average pool: single sublane-reduce sum + one fused scale (f32 accumulate).
    pooled = jnp.sum(feat_ref[0].astype(jnp.float32), axis=0, keepdims=True) * (1.0 / s)  # (1, C)
    # Inception-internal dropout on the conceptual 2048-wide pooled vector, with the 64x
    # channel replication folded into the grouped fc weight:
    #   w_eff[e, c] = sum_g m1[g, c] * fc_w[32*g + c, e]
    w_eff = jnp.sum(m1_ref[0][:, None, :] * w_ref[...], axis=0)                    # (E, C)
    # fc: contract over C (rhs stored channel-minor -> NT matmul), f32 accumulation.
    logits = jax.lax.dot_general(pooled, w_eff, (((1,), (1,)), ((), ())),
                                 preferred_element_type=jnp.float32) + b_ref[...]  # (1, E)
    feats = jnp.maximum(logits, 0.0)                        # self.relu
    o_ref[0] = (feats * m2_ref[0]).astype(o_ref.dtype)      # self.dropout


def head(feat, m1_g, w_t, b, m2):
    B, S, C = feat.shape
    G, E, _ = w_t.shape
    return pl.pallas_call(
        head_kernel,
        out_shape=jax.ShapeDtypeStruct((B, 1, E), jnp.float32),
        grid=(B,),
        in_specs=[
            pl.BlockSpec((1, S, C), lambda i: (i, 0, 0)),
            pl.BlockSpec((1, G, C), lambda i: (i, 0, 0)),
            pl.BlockSpec((G, E, C), lambda i: (0, 0, 0)),
            pl.BlockSpec((1, E), lambda i: (0, 0)),
            pl.BlockSpec((1, 1, E), lambda i: (i, 0, 0)),
        ],
        out_specs=pl.BlockSpec((1, 1, E), lambda i: (i, 0, 0)),
        compiler_params=pltpu.CompilerParams(dimension_semantics=("parallel",)),
    )(feat, m1_g, w_t, b, m2)


# ---------------------------------------------------------------------------
# Parameter init (deterministic, in-script — synthetic, not a checkpoint load)
# ---------------------------------------------------------------------------
def init_params(key):
    k_conv, k_fcw, k_fcb = jax.random.split(key, 3)
    conv_w = jax.random.normal(k_conv, (COUT, 3, 3, 3), jnp.float32) * 0.1       # OIHW
    bn_scale = jnp.full((1, COUT), 1.0 / jnp.sqrt(1.0 + 1e-3), jnp.float32)      # gamma/sqrt(var+eps)
    bn_bias = jnp.zeros((1, COUT), jnp.float32)                                  # beta - mean*scale
    fc_w = jax.random.normal(k_fcw, (FC_IN, EMBED_SIZE), jnp.float32) * 0.02
    fc_b = jax.random.normal(k_fcb, (1, EMBED_SIZE), jnp.float32) * 0.01
    return dict(conv_w=conv_w, bn_scale=bn_scale, bn_bias=bn_bias,
                fc_w=fc_w, fc_b=fc_b)


# ---------------------------------------------------------------------------
# Forward (mirrors CNNInception.forward; module defaults to training=True)
# ---------------------------------------------------------------------------
def cnn_inception_forward(images_nchw, params, dropout_key, training=True):
    B, _, H, W = images_nchw.shape
    x = jnp.transpose(images_nchw, (0, 2, 3, 1))              # NCHW -> NHWC (glue)

    # --- im2col for Conv2d_1a_3x3 (3x3, stride 2, no padding) -----------------
    # TODO(synk): fuse im2col into the stem kernel (strided in-kernel loads) to cut stem
    # HBM traffic ~3x at real 299x299 inputs; kept in the XLA wrapper for this version.
    Ho, Wo = (H - 3) // 2 + 1, (W - 3) // 2 + 1
    cols = []
    for kh in range(3):
        for kw in range(3):
            cols.append(x[:, kh:kh + 2 * (Ho - 1) + 1:2,
                            kw:kw + 2 * (Wo - 1) + 1:2, :])            # [B,Ho,Wo,Cin]
    patches = jnp.stack(cols, axis=3).reshape(B * Ho * Wo, CONV_K)      # (kh,kw,cin) order

    P = patches.shape[0]
    tm = _pick_row_tile(P)
    P_pad = pl.cdiv(P, tm) * tm
    patches = jnp.pad(patches, ((0, P_pad - P),
                                (0, K_PAD - CONV_K))).astype(jnp.bfloat16)

    # Fold BatchNorm scale into the conv weight; pad K 27->32 and Cout 32->128 so the
    # stem output is lane-dense and the MXU gets one efficient tile; bf16 matmul inputs.
    w_mat = jnp.transpose(params["conv_w"], (2, 3, 1, 0)).reshape(CONV_K, COUT)
    w_mat = w_mat * params["bn_scale"]                                   # gamma/sqrt(var+eps)
    w_mat = jnp.pad(w_mat, ((0, K_PAD - CONV_K),
                            (0, COUT_PAD - COUT))).astype(jnp.bfloat16)
    bias = jnp.pad(params["bn_bias"], ((0, 0), (0, COUT_PAD - COUT)))    # f32 (1, 128)

    stem = stem_conv(patches, w_mat, bias, tm=tm)                        # (P_pad, 128) bf16
    stem = stem[:P, :COUT].reshape(B, Ho, Wo, COUT)

    # TODO(synk): pretrained InceptionV3 trunk (Conv2d_2a..Mixed_7c) not reimplemented;
    # deterministic stand-in: strided spatial slice to 8x8.  The 64x channel replication
    # to 2048 is folded into the head kernel (never materialized in HBM).
    if Ho < 15 or Wo < 15:
        raise ValueError(f"trunk stand-in needs stem output >= 15x15, got {Ho}x{Wo}")
    feat = stem[:, :15:2, :15:2, :].reshape(B, 8 * 8, COUT)              # (B, 64, 32) bf16

    keep = 1.0 - DROP_P
    if training:  # nn.Module default mode after __init__ -> dropouts active
        k1, k2 = jax.random.split(dropout_key)
        m1 = jax.random.bernoulli(k1, keep, (B, FC_IN)).astype(jnp.float32) / keep
        m2 = jax.random.bernoulli(k2, keep, (B, EMBED_SIZE)).astype(jnp.float32) / keep
    else:
        m1 = jnp.ones((B, FC_IN), jnp.float32)
        m2 = jnp.ones((B, EMBED_SIZE), jnp.float32)

    # Group the 2048-wide dropout mask and fc weight into (group, channel) form so the
    # head kernel can fold the 64x channel replication:  fc_w[32*g + c, e] -> w_t[g, e, c].
    m1_g = m1.reshape(B, GROUPS, COUT)                                   # (B, 64, 32)
    w_t = jnp.transpose(params["fc_w"].reshape(GROUPS, COUT, EMBED_SIZE),
                        (0, 2, 1))                                       # (64, E, 32)

    out = head(feat, m1_g, w_t, params["fc_b"], m2.reshape(B, 1, EMBED_SIZE))
    return out.reshape(B, EMBED_SIZE)                                    # [B, embed_size]


if __name__ == "__main__":
    key = jax.random.PRNGKey(0)
    k_img, k_params, k_drop = jax.random.split(key, 3)

    B, H, W = 2, 32, 32
    images = jax.random.normal(k_img, (B, 3, H, W), jnp.float32)   # NCHW like PyTorch

    params = init_params(k_params)
    out = cnn_inception_forward(images, params, k_drop, training=True)
    out = jax.block_until_ready(out)

    assert out.shape == (B, EMBED_SIZE), out.shape
    assert bool(jnp.all(out >= 0.0))   # ReLU (+ dropout zeroing) => non-negative
    print("KERNEL_OK")
</pallas_src>

<mosaic_0001>
module attributes {stable_mosaic.version = 11 : i64} {
  func.func @stem_conv_kernel(%arg0: i32, %arg1: memref<256x32xbf16, #tpu.memory_space<vmem>>, %arg2: memref<32x128xbf16, #tpu.memory_space<vmem>>, %arg3: memref<1x128xf32, #tpu.memory_space<vmem>>, %arg4: memref<256x128xbf16, #tpu.memory_space<vmem>>) attributes {dimension_semantics = [#tpu.dimension_semantics<parallel>], iteration_bounds = array<i64: 2>, scalar_prefetch = 0 : i64, scratch_operands = 0 : i64, tpu.core_type = #tpu.core_type<tc>, window_params = [{transform_indices = @transform_0, window_bounds = array<i64: 256, 32>}, {pipeline_mode = #tpu.pipeline_mode<synchronous>, transform_indices = @transform_1, window_bounds = array<i64: 32, 128>}, {pipeline_mode = #tpu.pipeline_mode<synchronous>, transform_indices = @transform_2, window_bounds = array<i64: 1, 128>}, {transform_indices = @transform_3, window_bounds = array<i64: 256, 128>}]} {
    %c0 = arith.constant 0 : index
    %c0_0 = arith.constant 0 : index
    %0 = vector.load %arg1[%c0, %c0_0] : memref<256x32xbf16, #tpu.memory_space<vmem>>, vector<256x32xbf16>
    %c0_1 = arith.constant 0 : index
    %c0_2 = arith.constant 0 : index
    %1 = vector.load %arg2[%c0_1, %c0_2] : memref<32x128xbf16, #tpu.memory_space<vmem>>, vector<32x128xbf16>
    %cst = arith.constant dense<0.000000e+00> : vector<256x128xf32>
    %2 = tpu.matmul %0, %1, %cst {dimension_numbers = #tpu.dot_dimension_numbers<[1], [0], [0], [1], [0, 0, 1, 1], [], []>} : vector<256x32xbf16>, vector<32x128xbf16>, vector<256x128xf32> -> vector<256x128xf32>
    %c0_3 = arith.constant 0 : index
    %c0_4 = arith.constant 0 : index
    %3 = vector.load %arg3[%c0_3, %c0_4] : memref<1x128xf32, #tpu.memory_space<vmem>>, vector<1x128xf32>
    %4 = vector.broadcast %3 : vector<1x128xf32> to vector<256x128xf32>
    %5 = arith.addf %2, %4 : vector<256x128xf32>
    %cst_5 = arith.constant 0.000000e+00 : f32
    %6 = vector.broadcast %cst_5 : f32 to vector<256x128xf32>
    %7 = arith.maximumf %5, %6 : vector<256x128xf32>
    %8 = arith.truncf %7 : vector<256x128xf32> to vector<256x128xbf16>
    %c0_6 = arith.constant 0 : index
    %c0_7 = arith.constant 0 : index
    %9 = vector.load %arg4[%c0_6, %c0_7] : memref<256x128xbf16, #tpu.memory_space<vmem>>, vector<256x128xbf16>
    tpu.vector_store %arg4[%c0_6, %c0_7], %8 {strides = array<i32>} : memref<256x128xbf16, #tpu.memory_space<vmem>>, vector<256x128xbf16>,
    return
  }
  func.func @transform_0(%arg0: i32) -> (i32, i32) {
    %c0_i32 = arith.constant 0 : i32
    %c0_i32_0 = arith.constant 0 : i32
    return %arg0, %c0_i32 : i32, i32
  }
  func.func @transform_1(%arg0: i32) -> (i32, i32) {
    %c0_i32 = arith.constant 0 : i32
    %c0_i32_0 = arith.constant 0 : i32
    %c0_i32_1 = arith.constant 0 : i32
    return %c0_i32, %c0_i32_0 : i32, i32
  }
  func.func @transform_2(%arg0: i32) -> (i32, i32) {
    %c0_i32 = arith.constant 0 : i32
    %c0_i32_0 = arith.constant 0 : i32
    %c0_i32_1 = arith.constant 0 : i32
    return %c0_i32, %c0_i32_0 : i32, i32
  }
  func.func @transform_3(%arg0: i32) -> (i32, i32) {
    %c0_i32 = arith.constant 0 : i32
    %c0_i32_0 = arith.constant 0 : i32
    return %arg0, %c0_i32 : i32, i32
  }
}

</mosaic_0001>

<bundles_post_ra>
// kernel: tpu_custom_call.1
= control target key start
LH: loop header
LB: loop body
LE: loop exit
PB: predicated region body
PF: predicated region fallthrough
CT: control target
= control target key end

     0   :  { %8 = vsyncpa [#allocation3], 0  ;;  %s1149_s0 = inlined_call_operand.vmem [shape: bf16[512,32], index: 0, kind: input, shape index: {}]   ;;  %s1150_s1 = inlined_call_operand.vmem [shape: bf16[32,128], index: 1, kind: input, shape index: {}]   ;;  %s1151_s2 = inlined_call_operand.vmem [shape: f32[1,128], index: 2, kind: input, shape index: {}]   ;;  %s1152_s3 = inlined_call_operand.hbm [shape: bf16[512,128], index: 3, kind: output, shape index: {}]  }
   0x1   :  { %10 = vsyncpa [#allocation3 + $0x1], 0  ;;  %s965_s12 = smov 0   ;;  %s967_s13 = smov 0  }
   0x2   :  { %s969_s14 = smov 0   ;;  %s971_s15 = smov 0  }
   0x3 LB: > { %s986_s16 = sadd.s32 4294967295, %s941_s15   ;;  %s617_s17 = sadd.s32 4294967294, %s941_s15   ;;  %s941_s15 = sphi %s971_s15, %s1158_s15   ;;  %s937_s14 = sphi %s969_s14, %s1157_s14   ;;  %s933_s13 = sphi %s967_s13, %s1156_s13   ;;  %s929_s12 = sphi %s965_s12, %s1155_s12  }
   0x4   : > { %s990_s18 = sadd.s32 1, %s941_s15   ;;  %s91_s19 = sadd.s32 1, %s937_s14 }
   0x5   : > { %s88_s20 = ssub.s32 %s941_s15, %s990_s18  ;;  %p101_p0 = scmp.ne.s32.totalorder %s937_s14, %s933_s13 }
   0x6   : > { %p89_p1 = scmp.eq.s32.totalorder %s88_s20, 0  ;;  %p102_p2 = scmp.eq.s32.totalorder %s986_s16, 1 }
   0x7   : > { %p107_p3 = scmp.ne.s32.totalorder %s933_s13, %s929_s12  ;;  %p108_p4 = scmp.eq.s32.totalorder %s617_s17, 1 }
   0x8   : > { %s1001_s21 = scalar_select %p89_p1, %s937_s14, %s91_s19  }
   0x9   : > { %p1003_p5 = por %p102_p2, %p101_p0  ;;  %p1007_p6 = por %p108_p4, %p107_p3 }
   0xa   : > { %p620_p7 = scmp.ge.s32.totalorder %s941_s15, 1  ;;  %p141_p8 = scmp.lt.s32.totalorder %s941_s15, 3 }
   0xc   : > { %p142_p9 = pnand %p620_p7, %p141_p8 }
   0xd   : > { %s622_s26 = sshll.u32 (!%p142_p9), %s986_s16, 5  ;;  %s162_s8 = sand.u32 (!%p142_p9), 1, %s933_s13  }
   0xe   : > { %145 = sbr.rel (%p142_p9) target bundleno = 227 (0xe3), region = 32  ;;  %p166_p10 = scmp.lt.s32.totalorder (!%p142_p9), %s622_s26, 63 }
   0xf   : > { %s621_s9 = sshll.u32 (!%p142_p9), %s162_s8, 7  ;;  %s735_s11 = sshll.u32 (!%p142_p9), %s986_s16, 7 }
  0x10   : > { %s1071_s10 = scalar_lea.vmem (!%p142_p9), [#allocation2], %s621_s9  ;;  %s551_s20 = scalar_lea.hbm (!%p142_p9), %s1152_s3, %s735_s11 }
  0x11   : > { %s552_s16 = sshll.u32 (!%p142_p9), %s1071_s10, 4  ;;  %s554_s24 = sshll.u32 (!%p142_p9), %s551_s20, 4  ;;  %s553_s16 = int_to_ptr.vmem [resolvable:$true] %s552_s16  ;;  %s555_s24 = int_to_ptr.hbm [resolvable:$true] %s554_s24 }
  0x12   : > { %s540_s25 = scalar_lea.sflag (!%p142_p9), [#allocation3], %s162_s8  ;;  %s899_s30 = scalar_lea.hbm (!%p142_p9), %s1152_s3, 256 }
  0x13   : > { %v734_v0 = vld [vmem:[%s1150_s1 + $0x8] sm:$0xff]  ;;  %v733_v1 = vld [vmem:[%s1150_s1] sm:$0xff]  ;;  %s1160_s26 = smov (!%p166_p10, %s622_s26), 63  ;;  %vm305_vm0 = vcmask 261120  }
  0x14   : > { %360 = vmatpush.bf16.msra.mxu0 %v734_v0  ;;  %831 = vmatpush.bf16.msra.mxu1 %v734_v0  ;;  %s623_s29 = sshll.u32 %s1160_s26, 2  ;;  %v1060_v20 = vld [vmem:[%s1151_s2] ss:$0 sm:$0xff]  ;;  %s893_s26 = sshra.s32 %s555_s24, 4  ;;  %s894_s26 = int_to_ptr.hbm [resolvable:$true] %s893_s26 }
  0x15   : > { %832 = vmatpush.bf16.msra.mxu2 %v734_v0  ;;  %833 = vmatpush.bf16.msra.mxu3 %v734_v0  ;;  %s1023_s5 = scalar_lea.vmem %s1149_s0, %s623_s29  ;;  %s895_s27 = scalar_lea.hbm %s894_s26, 128 }
  0x16   : > { %v717_v2 = vld [vmem:[%s1023_s5] sm:$0xff]  ;;  %v718_v6 = vld [vmem:[%s1023_s5 + $0x8] sm:$0xff]  ;;  %v719_v10 = vld [vmem:[%s1023_s5 + $0x10] sm:$0xff]  ;;  %p896_p11 = scmp.ne.s32.totalorder %s894_s26, %s895_s27  ;;  %p900_p0 = scmp.lt.s32.totalorder %s894_s26, %s1152_s3 }
  0x17   : > { %v721_v3 = vld [vmem:[%s1023_s5 + $0x20] sm:$0xff]  ;;  %v722_v7 = vld [vmem:[%s1023_s5 + $0x28] sm:$0xff]  ;;  %v723_v11 = vld [vmem:[%s1023_s5 + $0x30] sm:$0xff]  ;;  %p901_p1 = scmp.lt.s32.totalorder %s899_s30, %s895_s27 }
  0x18   : > { %361 = vmatpush.bf16.msra.mxu0 %v733_v1  ;;  %834 = vmatpush.bf16.msra.mxu1 %v733_v1  ;;  %v725_v4 = vld [vmem:[%s1023_s5 + $0x40] sm:$0xff]  ;;  %v726_v8 = vld [vmem:[%s1023_s5 + $0x48] sm:$0xff]  ;;  %v727_v12 = vld [vmem:[%s1023_s5 + $0x50] sm:$0xff]  ;;  %p897_p12 = pnand %p896_p11, %p1003_p5 }
  0x19   : > { %835 = vmatpush.bf16.msra.mxu2 %v733_v1  ;;  %836 = vmatpush.bf16.msra.mxu3 %v733_v1  ;;  %v729_v5 = vld [vmem:[%s1023_s5 + $0x60] sm:$0xff]  ;;  %v730_v9 = vld [vmem:[%s1023_s5 + $0x68] sm:$0xff]  ;;  %v731_v13 = vld [vmem:[%s1023_s5 + $0x70] sm:$0xff]  ;;  %p902_p2 = por %p901_p1, %p900_p0 }
  0x1a   : > { %v720_v14 = vld [vmem:[%s1023_s5 + $0x18] sm:$0xff]  ;;  %p898_p13 = pneg %p897_p12 }
  0x1b   : > { %696 = vmatmul.msk.bf16.vlgmr.msra.gmra.mxu0 %vm305_vm0, %v717_v2  ;;  %700 = vmatmul.msk.bf16.vlgmr.msra.gmra.mxu1 %vm305_vm0, %v721_v3  ;;  %v724_v15 = vld [vmem:[%s1023_s5 + $0x38] sm:$0xff] }
  0x1c   : > { %704 = vmatmul.msk.bf16.vlgmr.msra.gmra.mxu2 %vm305_vm0, %v725_v4  ;;  %708 = vmatmul.msk.bf16.vlgmr.msra.gmra.mxu3 %vm305_vm0, %v729_v5  ;;  %v728_v16 = vld [vmem:[%s1023_s5 + $0x58] sm:$0xff]  ;;  %p903_p3 = pnand %p902_p2, %p898_p13 }
  0x1d   : > { %v732_v17 = vld [vmem:[%s1023_s5 + $0x78] sm:$0xff] }
  0x2b   : > { %697 = vmatmul.msk.bf16.gmra.mxu0 %vm305_vm0, %v718_v6  ;;  %701 = vmatmul.msk.bf16.gmra.mxu1 %vm305_vm0, %v722_v7 }
  0x2c   : > { %705 = vmatmul.msk.bf16.gmra.mxu2 %vm305_vm0, %v726_v8  ;;  %709 = vmatmul.msk.bf16.gmra.mxu3 %vm305_vm0, %v730_v9 }
  0x3b   : > { %698 = vmatmul.msk.bf16.gmra.mxu0 %vm305_vm0, %v719_v10  ;;  %702 = vmatmul.msk.bf16.gmra.mxu1 %vm305_vm0, %v723_v11 }
  0x3c   : > { %706 = vmatmul.msk.bf16.gmra.mxu2 %vm305_vm0, %v727_v12  ;;  %710 = vmatmul.msk.bf16.gmra.mxu3 %vm305_vm0, %v731_v13 }
  0x4b   : > { %699 = vmatmul.msk.bf16.gmra.mxu0 %vm305_vm0, %v720_v14  ;;  %703 = vmatmul.msk.bf16.gmra.mxu1 %vm305_vm0, %v724_v15 }
  0x4c   : > { %707 = vmatmul.msk.bf16.gmra.mxu2 %vm305_vm0, %v728_v16  ;;  %711 = vmatmul.msk.bf16.gmra.mxu3 %vm305_vm0, %v732_v17 }
  0x98   : > { %v363_v18 = vpop.f32.mrf.mxu0  ;;  %v383_v19 = vpop.f32.mrf.mxu1 }
  0x99   : > { %v364_v21 = vadd.f32 %v1060_v20, %v363_v18  ;;  %v384_v22 = vadd.f32 %v1060_v20, %v383_v19 }
  0x9b   : > { %v443_v29 = vmax.f32 %v364_v21, 0.0  ;;  %v451_v30 = vmax.f32 %v384_v22, 0.0 }
  0x9f   : > { %v403_v23 = vpop.f32.mrf.mxu2  ;;  %v423_v24 = vpop.f32.mrf.mxu3 }
  0xa0   : > { %v365_v25 = vpop.f32.mrf.mxu0  ;;  %v385_v26 = vpop.f32.mrf.mxu1  ;;  %v404_v35 = vadd.f32 %v1060_v20, %v403_v23  ;;  %v424_v36 = vadd.f32 %v1060_v20, %v423_v24 }
  0xa1   : > { %v366_v27 = vadd.f32 %v1060_v20, %v365_v25  ;;  %v386_v28 = vadd.f32 %v1060_v20, %v385_v26 }
  0xa2   : > { %v459_v43 = vmax.f32 %v404_v35, 0.0  ;;  %v467_v44 = vmax.f32 %v424_v36, 0.0 }
  0xa3   : > { %v444_v31 = vmax.f32 %v366_v27, 0.0  ;;  %v452_v32 = vmax.f32 %v386_v28, 0.0 }
  0xa5   : > { %v739_v33 = vpack.c.bf16 %v444_v31, %v443_v29  ;;  %v759_v34 = vpack.c.bf16 %v452_v32, %v451_v30 }
  0xa7   : > { %740 = vst [vmem:[%s1071_s10] sm:$0xff] %v739_v33   ;;  %v405_v37 = vpop.f32.mrf.mxu2  ;;  %v425_v38 = vpop.f32.mrf.mxu3 }
  0xa8   : > { %819 = vst [vmem:[%s1071_s10 + $0x20] sm:$0xff] %v759_v34   ;;  %v406_v39 = vadd.f32 %v1060_v20, %v405_v37  ;;  %v426_v40 = vadd.f32 %v1060_v20, %v425_v38  ;;  %v368_v41 = vpop.f32.mrf.mxu0  ;;  %v388_v42 = vpop.f32.mrf.mxu1 }
  0xa9   : > { %v369_v49 = vadd.f32 %v1060_v20, %v368_v41  ;;  %v389_v50 = vadd.f32 %v1060_v20, %v388_v42 }
  0xaa   : > { %v460_v45 = vmax.f32 %v406_v39, 0.0  ;;  %v468_v46 = vmax.f32 %v426_v40, 0.0 }
  0xab   : > { %v445_v57 = vmax.f32 %v369_v49, 0.0  ;;  %v453_v58 = vmax.f32 %v389_v50, 0.0 }
  0xac   : > { %v779_v47 = vpack.c.bf16 %v460_v45, %v459_v43  ;;  %v799_v48 = vpack.c.bf16 %v468_v46, %v467_v44 }
  0xae   : > { %823 = vst [vmem:[%s1071_s10 + $0x40] sm:$0xff] %v779_v47  }
  0xaf   : > { %827 = vst [vmem:[%s1071_s10 + $0x60] sm:$0xff] %v799_v48   ;;  %v408_v51 = vpop.f32.mrf.mxu2  ;;  %v428_v52 = vpop.f32.mrf.mxu3 }
  0xb0   : > { %v370_v53 = vpop.f32.mrf.mxu0  ;;  %v390_v54 = vpop.f32.mrf.mxu1  ;;  %v409_v63 = vadd.f32 %v1060_v20, %v408_v51  ;;  %v429_v0 = vadd.f32 %v1060_v20, %v428_v52 }
  0xb1   : > { %v371_v55 = vadd.f32 %v1060_v20, %v370_v53  ;;  %v391_v56 = vadd.f32 %v1060_v20, %v390_v54 }
  0xb2   : > { %v461_v7 = vmax.f32 %v409_v63, 0.0  ;;  %v469_v8 = vmax.f32 %v429_v0, 0.0 }
  0xb3   : > { %v446_v59 = vmax.f32 %v371_v55, 0.0  ;;  %v454_v60 = vmax.f32 %v391_v56, 0.0 }
  0xb5   : > { %v744_v61 = vpack.c.bf16 %v446_v59, %v445_v57  ;;  %v764_v62 = vpack.c.bf16 %v454_v60, %v453_v58 }
  0xb7   : > { %816 = vst [vmem:[%s1071_s10 + $0x8] sm:$0xff] %v744_v61   ;;  %v410_v1 = vpop.f32.mrf.mxu2  ;;  %v430_v2 = vpop.f32.mrf.mxu3 }
  0xb8   : > { %820 = vst [vmem:[%s1071_s10 + $0x28] sm:$0xff] %v764_v62   ;;  %v411_v3 = vadd.f32 %v1060_v20, %v410_v1  ;;  %v431_v4 = vadd.f32 %v1060_v20, %v430_v2  ;;  %v373_v5 = vpop.f32.mrf.mxu0  ;;  %v393_v6 = vpop.f32.mrf.mxu1 }
  0xb9   : > { %v374_v13 = vadd.f32 %v1060_v20, %v373_v5  ;;  %v394_v14 = vadd.f32 %v1060_v20, %v393_v6 }
  0xba   : > { %v462_v9 = vmax.f32 %v411_v3, 0.0  ;;  %v470_v10 = vmax.f32 %v431_v4, 0.0 }
  0xbb   : > { %v447_v22 = vmax.f32 %v374_v13, 0.0  ;;  %v455_v23 = vmax.f32 %v394_v14, 0.0 }
  0xbc   : > { %v784_v11 = vpack.c.bf16 %v462_v9, %v461_v7  ;;  %v804_v12 = vpack.c.bf16 %v470_v10, %v469_v8 }
  0xbe   : > { %824 = vst [vmem:[%s1071_s10 + $0x48] sm:$0xff] %v784_v11  }
  0xbf   : > { %828 = vst [vmem:[%s1071_s10 + $0x68] sm:$0xff] %v804_v12   ;;  %v413_v15 = vpop.f32.mrf.mxu2  ;;  %v433_v16 = vpop.f32.mrf.mxu3 }
  0xc0   : > { %v375_v17 = vpop.f32.mrf.mxu0  ;;  %v395_v18 = vpop.f32.mrf.mxu1  ;;  %v414_v28 = vadd.f32 %v1060_v20, %v413_v15  ;;  %v434_v29 = vadd.f32 %v1060_v20, %v433_v16 }
  0xc1   : > { %v376_v19 = vadd.f32 %v1060_v20, %v375_v17  ;;  %v396_v21 = vadd.f32 %v1060_v20, %v395_v18 }
  0xc2   : > { %v463_v36 = vmax.f32 %v414_v28, 0.0  ;;  %v471_v37 = vmax.f32 %v434_v29, 0.0 }
  0xc3   : > { %v448_v24 = vmax.f32 %v376_v19, 0.0  ;;  %v456_v25 = vmax.f32 %v396_v21, 0.0 }
  0xc5   : > { %v749_v26 = vpack.c.bf16 %v448_v24, %v447_v22  ;;  %v769_v27 = vpack.c.bf16 %v456_v25, %v455_v23 }
  0xc7   : > { %817 = vst [vmem:[%s1071_s10 + $0x10] sm:$0xff] %v749_v26   ;;  %v415_v30 = vpop.f32.mrf.mxu2  ;;  %v435_v31 = vpop.f32.mrf.mxu3 }
  0xc8   : > { %821 = vst [vmem:[%s1071_s10 + $0x30] sm:$0xff] %v769_v27   ;;  %v416_v32 = vadd.f32 %v1060_v20, %v415_v30  ;;  %v436_v33 = vadd.f32 %v1060_v20, %v435_v31  ;;  %v378_v34 = vpop.f32.mrf.mxu0  ;;  %v398_v35 = vpop.f32.mrf.mxu1 }
  0xc9   : > { %v379_v42 = vadd.f32 %v1060_v20, %v378_v34  ;;  %v399_v43 = vadd.f32 %v1060_v20, %v398_v35 }
  0xca   : > { %v464_v38 = vmax.f32 %v416_v32, 0.0  ;;  %v472_v39 = vmax.f32 %v436_v33, 0.0 }
  0xcb   : > { %v449_v50 = vmax.f32 %v379_v42, 0.0  ;;  %v457_v51 = vmax.f32 %v399_v43, 0.0 }
  0xcc   : > { %v789_v40 = vpack.c.bf16 %v464_v38, %v463_v36  ;;  %v809_v41 = vpack.c.bf16 %v472_v39, %v471_v37 }
  0xce   : > { %825 = vst [vmem:[%s1071_s10 + $0x50] sm:$0xff] %v789_v40  }
  0xcf   : > { %829 = vst [vmem:[%s1071_s10 + $0x70] sm:$0xff] %v809_v41   ;;  %v418_v44 = vpop.f32.mrf.mxu2  ;;  %v438_v45 = vpop.f32.mrf.mxu3 }
  0xd0   : > { %v380_v46 = vpop.f32.mrf.mxu0  ;;  %v400_v47 = vpop.f32.mrf.mxu1  ;;  %v419_v56 = vadd.f32 %v1060_v20, %v418_v44  ;;  %v439_v57 = vadd.f32 %v1060_v20, %v438_v45 }
  0xd1   : > { %v381_v48 = vadd.f32 %v1060_v20, %v380_v46  ;;  %v401_v49 = vadd.f32 %v1060_v20, %v400_v47 }
  0xd2   : > { %v465_v62 = vmax.f32 %v419_v56, 0.0  ;;  %v473_v63 = vmax.f32 %v439_v57, 0.0 }
  0xd3   : > { %v450_v52 = vmax.f32 %v381_v48, 0.0  ;;  %v458_v53 = vmax.f32 %v401_v49, 0.0 }
  0xd5   : > { %v754_v54 = vpack.c.bf16 %v450_v52, %v449_v50  ;;  %v774_v55 = vpack.c.bf16 %v458_v53, %v457_v51 }
  0xd7   : > { %818 = vst [vmem:[%s1071_s10 + $0x18] sm:$0xff] %v754_v54   ;;  %v420_v58 = vpop.f32.mrf.mxu2  ;;  %v440_v59 = vpop.f32.mrf.mxu3 }
  0xd8   : > { %822 = vst [vmem:[%s1071_s10 + $0x38] sm:$0xff] %v774_v55   ;;  %v421_v60 = vadd.f32 %v1060_v20, %v420_v58  ;;  %v441_v61 = vadd.f32 %v1060_v20, %v440_v59 }
  0xda   : > { %v466_v0 = vmax.f32 %v421_v60, 0.0  ;;  %v474_v1 = vmax.f32 %v441_v61, 0.0 }
  0xdc   : > { %v794_v2 = vpack.c.bf16 %v466_v0, %v465_v62  ;;  %v814_v3 = vpack.c.bf16 %v474_v1, %v473_v63 }
  0xde   : > { %826 = vst [vmem:[%s1071_s10 + $0x58] sm:$0xff] %v794_v2  }
  0xdf   : > { %830 = vst [vmem:[%s1071_s10 + $0x78] sm:$0xff] %v814_v3  }
  0xe0   : > { %906 = shalt.err (!%p903_p3)
}
  0xe1   : > { %s943_s6 = smov 64   ;;  %s944_s7 = smov 4  }
  0xe2   : > { %837 = dma.vmem_to_hbm [thread:$0]  (%p1003_p5), %s553_s16, 2048, %s555_s24, %s540_s25, %s943_s6, %s943_s6, %s944_s7  }
  0xe3 PF: > { %p843_p4 = scmp.ge.s32.totalorder %s941_s15, 2  ;;  %s569_s8 = sand.u32 1, %s929_s12  }
  0xe4   : > { %s570_s9 = scalar_lea.sflag [#allocation3], %s569_s8 }
  0xe5   : > { %p840_p7 = pnand %p843_p4, %p1007_p6 }
  0xe7   : > { %p841_p8 = pneg %p840_p7 }
  0xe9   : > { %924 = dma.done.wait (%p841_p8), %s570_s9, 2048  }
  0xea   : > { %926 = vsyncadd (%p841_p8), %s570_s9, 4294965248  ;;  %p13_p9 = scmp.ge.s32.totalorder %s990_s18, 4   ;;  %s1155_s12 = smov %s933_s13 }
  0xeb   : > { %s1156_s13 = smov %s937_s14  ;;  %s1157_s14 = smov %s1001_s21 }
  0xec   : > { %s1158_s15 = smov %s990_s18  ;;  %15 = sbr.rel (!%p13_p9) target bundleno = 3 (0x3), region = 67 }
  0xf1   :  { %576 = vsyncpa [#allocation3], 1 }
  0xf2   :  { %578 = vsyncpa [#allocation3 + $0x1], 1 }

</bundles_post_ra>
